<compile_context>
chip_gen: v5e
topology: v5e:2x2
jax: 0.10.0
libtpu: 0.0.40
codegen_flags: <defaults>
</compile_context>

<pallas_src>
import math

import jax
import jax.numpy as jnp
from jax.experimental import pallas as pl
from jax.experimental.pallas import tpu as pltpu


def _packed_pos_enc_kernel(g_ref, w_ref, b_ref, ones_ref, o_ref):
    # g_ref:    [tn, P*max_len]          lane-dense packed input rows
    # w_ref:    [P*max_len, P*d_model]   block-diagonal weight (P copies of w_t)
    # b_ref:    [1, P*d_model]           tiled bias
    # ones_ref: [P*d_model, P*d_model]   block-diagonal ones (segment-sum matrix)
    # o_ref:    [tn, P*d_model]
    logits = jnp.dot(g_ref[...], w_ref[...],
                     preferred_element_type=jnp.float32) + b_ref[...]
    # Shared max across the whole packed row: subtracting one constant from
    # every segment of a row leaves each segment's softmax exact.
    m = jnp.max(logits, axis=-1, keepdims=True)
    e = jnp.exp(logits - m)
    # Per-d_model-segment sums via block-diagonal ones matmul; the result is
    # already broadcast to every lane of its own segment.
    denom = jnp.dot(e, ones_ref[...], preferred_element_type=jnp.float32)
    # Guard the pathological case where a whole segment underflowed under the
    # shared row max (0/0 -> NaN otherwise).
    denom = jnp.maximum(denom, jnp.float32(1e-30))
    o_ref[...] = (e * pl.reciprocal(denom)).astype(o_ref.dtype)
    # TODO(synk): dropout is identity in eval mode; training-mode dropout
    # (pltpu.prng_seed + pltpu.stateful_bernoulli) is not applied here.


def positional_encoding(g, w, b, *, tile_rows=1024, out_dtype=None):
    """softmax(g @ w.T + b, axis=-1); dropout = identity (eval mode).

    g: [..., max_len] f32, w: [d_model, max_len] (nn.Linear layout), b: [d_model].
    Returns [..., d_model] (same dtype as g unless out_dtype is given; bf16
    output is a valid traffic optimization on v6e/v7x if the consumer allows).
    """
    *lead, max_len = g.shape
    d_model = w.shape[0]
    out_dtype = out_dtype or g.dtype

    n = 1
    for s in lead:
        n *= s
    g2d = g.reshape(n, max_len)                       # free contiguous view

    # Lane-packing factor: make the g block 128 lanes wide (P*max_len) and the
    # output block a large multiple of 128 (P*d_model).
    P = max(1, min(8, 128 // max_len)) if max_len <= 128 else 1

    # Pad only up to a multiple of P (<= P-1 rows) so the packing reshape stays
    # a free view; there is NO tile-level padding (Pallas masks partial blocks).
    n_p = ((n + P - 1) // P) * P
    if n_p != n:
        g2d = jnp.pad(g2d, ((0, n_p - n), (0, 0)))
    rows_p = n_p // P
    gp = g2d.reshape(rows_p, P * max_len)             # free contiguous view

    # Small constant operands, built once, VMEM-resident across all grid steps.
    w_t = w.T.astype(jnp.float32)                     # [max_len, d_model]
    eye_p = jnp.eye(P, dtype=jnp.float32)
    w_bd = jnp.kron(eye_p, w_t)                       # [P*max_len, P*d_model]
    b_bd = jnp.tile(b.astype(jnp.float32).reshape(1, d_model), (1, P))
    ones_bd = jnp.kron(eye_p, jnp.ones((d_model, d_model), jnp.float32))

    # Row tile: big enough to amortize per-step overhead (~0.35 us), small
    # enough to give >= 4 grid steps for 2-TC sharding (v7x) and DMA overlap,
    # and trivially within the 32 MiB scoped-VMEM default.
    if rows_p <= 8:
        tn = rows_p                                   # one full block
    else:
        cap = ((pl.cdiv(rows_p, 4) + 7) // 8) * 8
        tn = max(8, min(tile_rows, cap))
    grid_n = pl.cdiv(rows_p, tn)

    kp, kd = P * max_len, P * d_model
    cost = pl.CostEstimate(
        flops=2 * rows_p * kp * kd + 2 * rows_p * kd * kd,
        transcendentals=2 * rows_p * kd,              # exp + reciprocal
        bytes_accessed=4 * (gp.size + w_bd.size + b_bd.size + ones_bd.size)
        + rows_p * kd * jnp.dtype(out_dtype).itemsize,
    )

    out_p = pl.pallas_call(
        _packed_pos_enc_kernel,
        out_shape=jax.ShapeDtypeStruct((rows_p, kd), out_dtype),
        grid_spec=pl.GridSpec(
            grid=(grid_n,),
            in_specs=[
                pl.BlockSpec((tn, kp), lambda i: (i, 0)),    # streamed rows
                pl.BlockSpec((kp, kd), lambda i: (0, 0)),    # resident weight
                pl.BlockSpec((1, kd), lambda i: (0, 0)),     # resident bias
                pl.BlockSpec((kd, kd), lambda i: (0, 0)),    # resident ones
            ],
            out_specs=pl.BlockSpec((tn, kd), lambda i: (i, 0)),
        ),
        compiler_params=pltpu.CompilerParams(
            dimension_semantics=("parallel",)),
        cost_estimate=cost,
    )(gp, w_bd, b_bd, ones_bd)

    out2d = out_p.reshape(n_p, d_model)               # free contiguous view
    if n_p != n:
        out2d = out2d[:n]
    return out2d.reshape(*lead, d_model)


if __name__ == "__main__":
    # Encoder params: max_len=16, d_model=32, dropout (eval -> identity).
    batch, seq = 2, 8
    max_len, d_model = 16, 32

    key = jax.random.PRNGKey(0)
    kg, kw, kb = jax.random.split(key, 3)

    # PositionalEncoding input g: [..., max_len].
    g = jax.random.normal(kg, (batch, seq, max_len), dtype=jnp.float32)

    # nn.Linear(max_len, d_model) init: U(-1/sqrt(in), 1/sqrt(in)), deterministic here.
    bound = 1.0 / math.sqrt(max_len)
    w = jax.random.uniform(kw, (d_model, max_len), jnp.float32, -bound, bound)
    b = jax.random.uniform(kb, (d_model,), jnp.float32, -bound, bound)

    out = positional_encoding(g, w, b)
    jax.block_until_ready(out)

    # Pure-JAX reference (exact reciprocal in the kernel -> tight tolerance).
    ref = jax.nn.softmax(g @ w.T + b, axis=-1)
    assert out.shape == (batch, seq, d_model)
    assert jnp.allclose(out, ref, atol=1e-5, rtol=1e-5), "mismatch vs reference"

    print("KERNEL_OK")
</pallas_src>

<mosaic_0001>
module attributes {stable_mosaic.version = 11 : i64} {
  func.func @_packed_pos_enc_kernel(%arg0: i32, %arg1: memref<2x128xf32, #tpu.memory_space<vmem>>, %arg2: memref<128x256xf32, #tpu.memory_space<vmem>>, %arg3: memref<1x256xf32, #tpu.memory_space<vmem>>, %arg4: memref<256x256xf32, #tpu.memory_space<vmem>>, %arg5: memref<2x256xf32, #tpu.memory_space<vmem>>) attributes {dimension_semantics = [#tpu.dimension_semantics<parallel>], iteration_bounds = array<i64: 1>, scalar_prefetch = 0 : i64, scratch_operands = 0 : i64, tpu.core_type = #tpu.core_type<tc>, window_params = [{transform_indices = @transform_0, window_bounds = array<i64: 2, 128>}, {pipeline_mode = #tpu.pipeline_mode<synchronous>, transform_indices = @transform_1, window_bounds = array<i64: 128, 256>}, {pipeline_mode = #tpu.pipeline_mode<synchronous>, transform_indices = @transform_2, window_bounds = array<i64: 1, 256>}, {pipeline_mode = #tpu.pipeline_mode<synchronous>, transform_indices = @transform_3, window_bounds = array<i64: 256, 256>}, {transform_indices = @transform_4, window_bounds = array<i64: 2, 256>}]} {
    %c0 = arith.constant 0 : index
    %c0_0 = arith.constant 0 : index
    %0 = vector.load %arg1[%c0, %c0_0] : memref<2x128xf32, #tpu.memory_space<vmem>>, vector<2x128xf32>
    %c0_1 = arith.constant 0 : index
    %c0_2 = arith.constant 0 : index
    %1 = vector.load %arg2[%c0_1, %c0_2] : memref<128x256xf32, #tpu.memory_space<vmem>>, vector<128x256xf32>
    %cst = arith.constant dense<0.000000e+00> : vector<2x256xf32>
    %2 = tpu.matmul %0, %1, %cst {dimension_numbers = #tpu.dot_dimension_numbers<[1], [0], [0], [1], [0, 0, 1, 1], [], []>} : vector<2x128xf32>, vector<128x256xf32>, vector<2x256xf32> -> vector<2x256xf32>
    %c0_3 = arith.constant 0 : index
    %c0_4 = arith.constant 0 : index
    %3 = vector.load %arg3[%c0_3, %c0_4] : memref<1x256xf32, #tpu.memory_space<vmem>>, vector<1x256xf32>
    %4 = vector.broadcast %3 : vector<1x256xf32> to vector<2x256xf32>
    %5 = arith.addf %2, %4 : vector<2x256xf32>
    %cst_5 = arith.constant dense<0xFF800000> : vector<2xf32>
    %6 = vector.multi_reduction <maximumf>, %5, %cst_5 [1] : vector<2x256xf32> to vector<2xf32>
    %7 = vector.shape_cast %6 : vector<2xf32> to vector<2x1xf32>
    %8 = vector.broadcast %7 : vector<2x1xf32> to vector<2x256xf32>
    %9 = arith.subf %5, %8 : vector<2x256xf32>
    %10 = math.exp %9 : vector<2x256xf32>
    %c0_6 = arith.constant 0 : index
    %c0_7 = arith.constant 0 : index
    %11 = vector.load %arg4[%c0_6, %c0_7] : memref<256x256xf32, #tpu.memory_space<vmem>>, vector<256x256xf32>
    %cst_8 = arith.constant dense<0.000000e+00> : vector<2x256xf32>
    %12 = tpu.matmul %10, %11, %cst_8 {dimension_numbers = #tpu.dot_dimension_numbers<[1], [0], [0], [1], [0, 0, 1, 1], [], []>} : vector<2x256xf32>, vector<256x256xf32>, vector<2x256xf32> -> vector<2x256xf32>
    %cst_9 = arith.constant 1.000000e-30 : f32
    %13 = vector.broadcast %cst_9 : f32 to vector<2x256xf32>
    %14 = arith.maximumf %12, %13 : vector<2x256xf32>
    %15 = tpu.reciprocal %14 : vector<2x256xf32> -> vector<2x256xf32>
    %16 = arith.mulf %10, %15 : vector<2x256xf32>
    %c0_10 = arith.constant 0 : index
    %c0_11 = arith.constant 0 : index
    %17 = vector.load %arg5[%c0_10, %c0_11] : memref<2x256xf32, #tpu.memory_space<vmem>>, vector<2x256xf32>
    tpu.vector_store %arg5[%c0_10, %c0_11], %16 {strides = array<i32>} : memref<2x256xf32, #tpu.memory_space<vmem>>, vector<2x256xf32>,
    return
  }
  func.func @transform_0(%arg0: i32) -> (i32, i32) {
    %c0_i32 = arith.constant 0 : i32
    %c0_i32_0 = arith.constant 0 : i32
    return %arg0, %c0_i32 : i32, i32
  }
  func.func @transform_1(%arg0: i32) -> (i32, i32) {
    %c0_i32 = arith.constant 0 : i32
    %c0_i32_0 = arith.constant 0 : i32
    %c0_i32_1 = arith.constant 0 : i32
    return %c0_i32, %c0_i32_0 : i32, i32
  }
  func.func @transform_2(%arg0: i32) -> (i32, i32) {
    %c0_i32 = arith.constant 0 : i32
    %c0_i32_0 = arith.constant 0 : i32
    %c0_i32_1 = arith.constant 0 : i32
    return %c0_i32, %c0_i32_0 : i32, i32
  }
  func.func @transform_3(%arg0: i32) -> (i32, i32) {
    %c0_i32 = arith.constant 0 : i32
    %c0_i32_0 = arith.constant 0 : i32
    %c0_i32_1 = arith.constant 0 : i32
    return %c0_i32, %c0_i32_0 : i32, i32
  }
  func.func @transform_4(%arg0: i32) -> (i32, i32) {
    %c0_i32 = arith.constant 0 : i32
    %c0_i32_0 = arith.constant 0 : i32
    return %arg0, %c0_i32 : i32, i32
  }
}

</mosaic_0001>

<bundles_post_ra>
// kernel: tpu_custom_call.1
= control target key start
LH: loop header
LB: loop body
LE: loop exit
PB: predicated region body
PF: predicated region fallthrough
CT: control target
= control target key end

     0   :  { %9 = vsyncpa [#allocation3], 0  ;;  %s562_s0 = inlined_call_operand.hbm [shape: f32[2,128], index: 0, kind: input, shape index: {}]   ;;  %s563_s1 = inlined_call_operand.hbm [shape: f32[128,256], index: 1, kind: input, shape index: {}]   ;;  %s564_s2 = inlined_call_operand.hbm [shape: f32[1,256], index: 2, kind: input, shape index: {}]   ;;  %s565_s3 = inlined_call_operand.hbm [shape: f32[256,256], index: 3, kind: input, shape index: {}]   ;;  %s566_s4 = inlined_call_operand.hbm [shape: f32[2,256], index: 4, kind: output, shape index: {}]  }
   0x1   :  { %10 = vsyncpa [#allocation6], 0 }
   0x2   :  { %11 = vsyncpa [#allocation9], 0  ;;  %s28_s17 = sshll.u32 %s563_s1, 4  ;;  %s29_s17 = int_to_ptr.hbm [resolvable:$true] %s28_s17 }
   0x3   :  { %12 = vsyncpa [#allocation4], 0  ;;  %s512_s18 = smov [#allocation5]   ;;  %s18_s22 = sshll.u32 %s562_s0, 4  ;;  %s19_s22 = int_to_ptr.hbm [resolvable:$true] %s18_s22 }
   0x4   :  { %s30_s19 = sshll.u32 %s512_s18, 4  ;;  %s513_s23 = smov 256   ;;  %s31_s19 = int_to_ptr.vmem [resolvable:$true] %s30_s19 }
   0x5   :  { %s514_s24 = smov 16   ;;  %s515_s25 = smov [#allocation2]  }
   0x6   :  { %36 = dma.hbm_to_vmem [thread:$0]  %s29_s17, 4096, %s31_s19, [#allocation6], %s513_s23, %s513_s23, %s514_s24  }
   0x7   :  { %s20_s26 = sshll.u32 %s515_s25, 4  ;;  %s42_s29 = sshll.u32 %s564_s2, 4  ;;  %s21_s26 = int_to_ptr.vmem [resolvable:$true] %s20_s26  ;;  %s43_s29 = int_to_ptr.hbm [resolvable:$true] %s42_s29 }
   0x8   :  { %23 = dma.hbm_to_vmem [thread:$0]  %s19_s22, 32, %s21_s26, [#allocation3]  }
   0x9   :  { %s52_s5 = sshll.u32 %s565_s3, 4  ;;  %s516_s6 = smov [#allocation7]   ;;  %s53_s5 = int_to_ptr.hbm [resolvable:$true] %s52_s5 }
   0xa   :  { %s44_s7 = sshll.u32 %s516_s6, 4  ;;  %s517_s0 = smov [#allocation8]   ;;  %s45_s7 = int_to_ptr.vmem [resolvable:$true] %s44_s7 }
   0xb   :  { %47 = dma.hbm_to_vmem [thread:$0]  %s43_s29, 32, %s45_s7, [#allocation6]  }
   0xc   :  { %s54_s8 = sshll.u32 %s517_s0, 4  ;;  %s55_s8 = int_to_ptr.vmem [resolvable:$true] %s54_s8 }
   0xd   :  { %60 = dma.hbm_to_vmem [thread:$0]  %s53_s5, 8192, %s55_s8, [#allocation9], %s513_s23, %s513_s23, %s514_s24  }
   0xe   :  { %504 = dma.done.wait [#allocation3], 32  }
   0xf   :  { %505 = vsyncadd [#allocation3], 4294967264 }
  0x10   :  { %506 = dma.done.wait [#allocation6], 4128  }
  0x11   :  { %507 = vsyncadd [#allocation6], 4294963168 }
  0x12   :  { %508 = dma.done.wait [#allocation9], 8192  }
  0x13   :  { %509 = vsyncadd [#allocation9], 4294959104  ;;  %v108_v0 = vld [vmem:[#allocation5 + $0xf0] sm:$0xff]  ;;  %v109_v1 = vld [vmem:[#allocation5 + $0xf8] sm:$0xff]  ;;  %vm156_vm0 = vcmask 1041408   ;;  %s518_s2 = smov [#allocation10]  }
  0x14   :  { %v106_v2 = vld [vmem:[#allocation5 + $0xe0] sm:$0xff]  ;;  %116 = vmatpush.msra.mxu0 %v108_v0  ;;  %136 = vmatpush.msra.mxu1 %v109_v1  ;;  %v107_v3 = vld [vmem:[#allocation5 + $0xe8] sm:$0xff]  ;;  %v104_v4 = vld [vmem:[#allocation5 + $0xd0] sm:$0xff]  ;;  %s355_s3 = sshll.u32 %s518_s2, 4  ;;  %s357_s11 = sshll.u32 %s566_s4, 4  ;;  %s356_s3 = int_to_ptr.vmem [resolvable:$true] %s355_s3  ;;  %s358_s11 = int_to_ptr.hbm [resolvable:$true] %s357_s11 }
  0x15   :  { %v105_v5 = vld [vmem:[#allocation5 + $0xd8] sm:$0xff]  ;;  %v102_v6 = vld [vmem:[#allocation5 + $0xc0] sm:$0xff]  ;;  %v103_v7 = vld [vmem:[#allocation5 + $0xc8] sm:$0xff] }
  0x16   :  { %117 = vmatpush.msra.mxu0 %v106_v2  ;;  %137 = vmatpush.msra.mxu1 %v107_v3  ;;  %v100_v8 = vld [vmem:[#allocation5 + $0xb0] sm:$0xff]  ;;  %v101_v9 = vld [vmem:[#allocation5 + $0xb8] sm:$0xff]  ;;  %v98_v10 = vld [vmem:[#allocation5 + $0xa0] sm:$0xff] }
  0x17   :  { %v99_v11 = vld [vmem:[#allocation5 + $0xa8] sm:$0xff]  ;;  %v96_v12 = vld [vmem:[#allocation5 + $0x90] sm:$0xff]  ;;  %v97_v13 = vld [vmem:[#allocation5 + $0x98] sm:$0xff] }
  0x18   :  { %118 = vmatpush.msra.mxu0 %v104_v4  ;;  %138 = vmatpush.msra.mxu1 %v105_v5  ;;  %v94_v14 = vld [vmem:[#allocation5 + $0x80] sm:$0xff]  ;;  %v95_v15 = vld [vmem:[#allocation5 + $0x88] sm:$0xff]  ;;  %v92_v16 = vld [vmem:[#allocation5 + $0x70] sm:$0xff] }
  0x19   :  { %v93_v17 = vld [vmem:[#allocation5 + $0x78] sm:$0xff]  ;;  %v90_v18 = vld [vmem:[#allocation5 + $0x60] sm:$0xff]  ;;  %v91_v19 = vld [vmem:[#allocation5 + $0x68] sm:$0xff] }
  0x1a   :  { %119 = vmatpush.msra.mxu0 %v102_v6  ;;  %139 = vmatpush.msra.mxu1 %v103_v7  ;;  %v88_v20 = vld [vmem:[#allocation5 + $0x50] sm:$0xff]  ;;  %v89_v21 = vld [vmem:[#allocation5 + $0x58] sm:$0xff]  ;;  %v86_v22 = vld [vmem:[#allocation5 + $0x40] sm:$0xff] }
  0x1b   :  { %v87_v23 = vld [vmem:[#allocation5 + $0x48] sm:$0xff]  ;;  %v84_v24 = vld [vmem:[#allocation5 + $0x30] sm:$0xff]  ;;  %v85_v25 = vld [vmem:[#allocation5 + $0x38] sm:$0xff] }
  0x1c   :  { %120 = vmatpush.msra.mxu0 %v100_v8  ;;  %140 = vmatpush.msra.mxu1 %v101_v9  ;;  %v82_v26 = vld [vmem:[#allocation5 + $0x20] sm:$0xff]  ;;  %v83_v27 = vld [vmem:[#allocation5 + $0x28] sm:$0xff]  ;;  %v80_v28 = vld [vmem:[#allocation5 + $0x10] sm:$0xff] }
  0x1d   :  { %v81_v29 = vld [vmem:[#allocation5 + $0x18] sm:$0xff]  ;;  %v78_v30 = vld [vmem:[#allocation5] sm:$0xff]  ;;  %v79_v31 = vld [vmem:[#allocation5 + $0x8] sm:$0xff] }
  0x1e   :  { %121 = vmatpush.msra.mxu0 %v98_v10  ;;  %141 = vmatpush.msra.mxu1 %v99_v11  ;;  %v77_v32 = vld [vmem:[#allocation2] sm:$0x3]  ;;  %v198_v33 = vld [vmem:[#allocation8 + $0xf0] sm:$0xff]  ;;  %v196_v37 = vld [vmem:[#allocation8 + $0xe0] sm:$0xff] }
  0x1f   :  { %v230_v34 = vld [vmem:[#allocation8 + $0x1f0] sm:$0xff]  ;;  %v199_v35 = vld [vmem:[#allocation8 + $0xf8] sm:$0xff]  ;;  %232 = vmatpush.msra.mxu2 %v198_v33  ;;  %v228_v38 = vld [vmem:[#allocation8 + $0x1e0] sm:$0xff] }
  0x20   :  { %122 = vmatpush.msra.mxu0 %v96_v12  ;;  %142 = vmatpush.msra.mxu1 %v97_v13  ;;  %v231_v36 = vld [vmem:[#allocation8 + $0x1f8] sm:$0xff]  ;;  %v197_v39 = vld [vmem:[#allocation8 + $0xe8] sm:$0xff]  ;;  %v194_v41 = vld [vmem:[#allocation8 + $0xd0] sm:$0xff] }
  0x21   :  { %252 = vmatpush.msra.mxu3 %v230_v34  ;;  %v229_v40 = vld [vmem:[#allocation8 + $0x1e8] sm:$0xff]  ;;  %233 = vmatpush.msra.mxu2 %v196_v37  ;;  %v226_v42 = vld [vmem:[#allocation8 + $0x1d0] sm:$0xff]  ;;  %v195_v43 = vld [vmem:[#allocation8 + $0xd8] sm:$0xff] }
  0x22   :  { %123 = vmatpush.msra.mxu0 %v94_v14  ;;  %143 = vmatpush.msra.mxu1 %v95_v15  ;;  %v227_v44 = vld [vmem:[#allocation8 + $0x1d8] sm:$0xff]  ;;  %v192_v45 = vld [vmem:[#allocation8 + $0xc0] sm:$0xff]  ;;  %v193_v47 = vld [vmem:[#allocation8 + $0xc8] sm:$0xff] }
  0x23   :  { %253 = vmatpush.msra.mxu3 %v228_v38  ;;  %v224_v46 = vld [vmem:[#allocation8 + $0x1c0] sm:$0xff]  ;;  %234 = vmatpush.msra.mxu2 %v194_v41  ;;  %v225_v48 = vld [vmem:[#allocation8 + $0x1c8] sm:$0xff]  ;;  %v190_v49 = vld [vmem:[#allocation8 + $0xb0] sm:$0xff] }
  0x24   :  { %124 = vmatpush.msra.mxu0 %v92_v16  ;;  %144 = vmatpush.msra.mxu1 %v93_v17  ;;  %v222_v50 = vld [vmem:[#allocation8 + $0x1b0] sm:$0xff]  ;;  %v191_v51 = vld [vmem:[#allocation8 + $0xb8] sm:$0xff]  ;;  %v188_v53 = vld [vmem:[#allocation8 + $0xa0] sm:$0xff] }
  0x25   :  { %254 = vmatpush.msra.mxu3 %v226_v42  ;;  %235 = vmatpush.msra.mxu2 %v192_v45  ;;  %v223_v52 = vld [vmem:[#allocation8 + $0x1b8] sm:$0xff]  ;;  %v220_v54 = vld [vmem:[#allocation8 + $0x1a0] sm:$0xff]  ;;  %v189_v55 = vld [vmem:[#allocation8 + $0xa8] sm:$0xff] }
  0x26   :  { %125 = vmatpush.msra.mxu0 %v90_v18  ;;  %145 = vmatpush.msra.mxu1 %v91_v19  ;;  %v221_v56 = vld [vmem:[#allocation8 + $0x1a8] sm:$0xff]  ;;  %v186_v57 = vld [vmem:[#allocation8 + $0x90] sm:$0xff]  ;;  %v187_v59 = vld [vmem:[#allocation8 + $0x98] sm:$0xff] }
  0x27   :  { %255 = vmatpush.msra.mxu3 %v224_v46  ;;  %236 = vmatpush.msra.mxu2 %v190_v49  ;;  %v218_v58 = vld [vmem:[#allocation8 + $0x190] sm:$0xff]  ;;  %v219_v60 = vld [vmem:[#allocation8 + $0x198] sm:$0xff]  ;;  %v184_v61 = vld [vmem:[#allocation8 + $0x80] sm:$0xff] }
  0x28   :  { %126 = vmatpush.msra.mxu0 %v88_v20  ;;  %146 = vmatpush.msra.mxu1 %v89_v21  ;;  %v216_v62 = vld [vmem:[#allocation8 + $0x180] sm:$0xff]  ;;  %v185_v63 = vld [vmem:[#allocation8 + $0x88] sm:$0xff]  ;;  %v182_v1 = vld [vmem:[#allocation8 + $0x70] sm:$0xff] }
  0x29   :  { %256 = vmatpush.msra.mxu3 %v222_v50  ;;  %237 = vmatpush.msra.mxu2 %v188_v53  ;;  %v217_v0 = vld [vmem:[#allocation8 + $0x188] sm:$0xff]  ;;  %v214_v2 = vld [vmem:[#allocation8 + $0x170] sm:$0xff]  ;;  %v183_v3 = vld [vmem:[#allocation8 + $0x78] sm:$0xff] }
  0x2a   :  { %127 = vmatpush.msra.mxu0 %v86_v22  ;;  %147 = vmatpush.msra.mxu1 %v87_v23  ;;  %v215_v4 = vld [vmem:[#allocation8 + $0x178] sm:$0xff]  ;;  %v180_v5 = vld [vmem:[#allocation8 + $0x60] sm:$0xff]  ;;  %v181_v7 = vld [vmem:[#allocation8 + $0x68] sm:$0xff] }
  0x2b   :  { %257 = vmatpush.msra.mxu3 %v220_v54  ;;  %238 = vmatpush.msra.mxu2 %v186_v57  ;;  %v212_v6 = vld [vmem:[#allocation8 + $0x160] sm:$0xff]  ;;  %v213_v8 = vld [vmem:[#allocation8 + $0x168] sm:$0xff]  ;;  %v110_v9 = vld [vmem:[#allocation7] sm:$0x3] }
  0x2c   :  { %128 = vmatpush.msra.mxu0 %v84_v24  ;;  %148 = vmatpush.msra.mxu1 %v85_v25  ;;  %v112_v10 = vperm.slane %v110_v9, 0  ;;  %v113_v11 = vperm.slane %v110_v9, 1  ;;  %v178_v19 = vld [vmem:[#allocation8 + $0x50] sm:$0xff]  ;;  %v179_v21 = vld [vmem:[#allocation8 + $0x58] sm:$0xff]  ;;  %v176_v23 = vld [vmem:[#allocation8 + $0x40] sm:$0xff] }
  0x2d   :  { %258 = vmatpush.msra.mxu3 %v218_v58  ;;  %239 = vmatpush.msra.mxu2 %v184_v61  ;;  %v210_v20 = vld [vmem:[#allocation8 + $0x150] sm:$0xff]  ;;  %v211_v22 = vld [vmem:[#allocation8 + $0x158] sm:$0xff]  ;;  %v208_v24 = vld [vmem:[#allocation8 + $0x140] sm:$0xff] }
  0x2e   :  { %129 = vmatpush.msra.mxu0 %v82_v26  ;;  %149 = vmatpush.msra.mxu1 %v83_v27  ;;  %v177_v25 = vld [vmem:[#allocation8 + $0x48] sm:$0xff]  ;;  %v174_v27 = vld [vmem:[#allocation8 + $0x30] sm:$0xff]  ;;  %v171_v37 = vld [vmem:[#allocation8 + $0x18] sm:$0xff] }
  0x2f   :  { %259 = vmatpush.msra.mxu3 %v216_v62  ;;  %240 = vmatpush.msra.mxu2 %v182_v1  ;;  %v209_v26 = vld [vmem:[#allocation8 + $0x148] sm:$0xff]  ;;  %v203_v38 = vld [vmem:[#allocation8 + $0x118] sm:$0xff] }
  0x30   :  { %130 = vmatpush.msra.mxu0 %v80_v28  ;;  %150 = vmatpush.msra.mxu1 %v81_v29  ;;  %v206_v28 = vld [vmem:[#allocation8 + $0x130] sm:$0xff]  ;;  %v175_v29 = vld [vmem:[#allocation8 + $0x38] sm:$0xff]  ;;  %v173_v33 = vld [vmem:[#allocation8 + $0x28] sm:$0xff] }
  0x31   :  { %260 = vmatpush.msra.mxu3 %v214_v2  ;;  %241 = vmatpush.msra.mxu2 %v180_v5  ;;  %v205_v34 = vld [vmem:[#allocation8 + $0x128] sm:$0xff] }
  0x32   :  { %131 = vmatpush.msra.mxu0 %v78_v30  ;;  %151 = vmatpush.msra.mxu1 %v79_v31  ;;  %v207_v30 = vld [vmem:[#allocation8 + $0x138] sm:$0xff]  ;;  %v172_v31 = vld [vmem:[#allocation8 + $0x20] sm:$0xff]  ;;  %v169_v41 = vld [vmem:[#allocation8 + $0x8] sm:$0xff] }
  0x33   :  { %132 = vmatmul.f32.vlgmr.msra.gmra.mxu0 %v77_v32  ;;  %152 = vmatmul.f32.vlgmr.msra.gmra.mxu1 %v77_v32  ;;  %v204_v32 = vld [vmem:[#allocation8 + $0x120] sm:$0xff]  ;;  %v201_v42 = vld [vmem:[#allocation8 + $0x108] sm:$0xff] }
  0x34   :  { %272 = vmatpush.msrb.mxu0 %v199_v35  ;;  %292 = vmatpush.msrb.mxu1 %v231_v36  ;;  %v170_v35 = vld [vmem:[#allocation8 + $0x10] sm:$0xff] }
  0x35   :  { %261 = vmatpush.msra.mxu3 %v212_v6  ;;  %242 = vmatpush.msra.mxu2 %v178_v19  ;;  %v202_v36 = vld [vmem:[#allocation8 + $0x110] sm:$0xff] }
  0x36   :  { %273 = vmatpush.msrb.mxu0 %v197_v39  ;;  %293 = vmatpush.msrb.mxu1 %v229_v40  ;;  %v168_v39 = vld [vmem:[#allocation8] sm:$0xff] }
  0x37   :  { %262 = vmatpush.msra.mxu3 %v210_v20  ;;  %243 = vmatpush.msra.mxu2 %v176_v23  ;;  %v200_v40 = vld [vmem:[#allocation8 + $0x100] sm:$0xff] }
  0x38   :  { %274 = vmatpush.msrb.mxu0 %v195_v43  ;;  %294 = vmatpush.msrb.mxu1 %v227_v44 }
  0x39   :  { %263 = vmatpush.msra.mxu3 %v208_v24  ;;  %244 = vmatpush.msra.mxu2 %v174_v27 }
  0x3a   :  { %275 = vmatpush.msrb.mxu0 %v193_v47  ;;  %295 = vmatpush.msrb.mxu1 %v225_v48 }
  0x3b   :  { %264 = vmatpush.msra.mxu3 %v206_v28  ;;  %245 = vmatpush.msra.mxu2 %v172_v31 }
  0x3c   :  { %276 = vmatpush.msrb.mxu0 %v191_v51  ;;  %296 = vmatpush.msrb.mxu1 %v223_v52 }
  0x3d   :  { %265 = vmatpush.msra.mxu3 %v204_v32  ;;  %246 = vmatpush.msra.mxu2 %v170_v35 }
  0x3e   :  { %277 = vmatpush.msrb.mxu0 %v189_v55  ;;  %297 = vmatpush.msrb.mxu1 %v221_v56 }
  0x3f   :  { %266 = vmatpush.msra.mxu3 %v202_v36  ;;  %247 = vmatpush.msra.mxu2 %v168_v39 }
  0x40   :  { %278 = vmatpush.msrb.mxu0 %v187_v59  ;;  %298 = vmatpush.msrb.mxu1 %v219_v60 }
  0x41   :  { %267 = vmatpush.msra.mxu3 %v200_v40 }
  0x42   :  { %279 = vmatpush.msrb.mxu0 %v185_v63  ;;  %299 = vmatpush.msrb.mxu1 %v217_v0 }
  0x44   :  { %280 = vmatpush.msrb.mxu0 %v183_v3  ;;  %300 = vmatpush.msrb.mxu1 %v215_v4 }
  0x46   :  { %281 = vmatpush.msrb.mxu0 %v181_v7  ;;  %301 = vmatpush.msrb.mxu1 %v213_v8 }
  0x48   :  { %282 = vmatpush.msrb.mxu0 %v179_v21  ;;  %302 = vmatpush.msrb.mxu1 %v211_v22 }
  0x4a   :  { %283 = vmatpush.msrb.mxu0 %v177_v25  ;;  %303 = vmatpush.msrb.mxu1 %v209_v26 }
  0x4c   :  { %284 = vmatpush.msrb.mxu0 %v175_v29  ;;  %304 = vmatpush.msrb.mxu1 %v207_v30 }
  0x4e   :  { %285 = vmatpush.msrb.mxu0 %v173_v33  ;;  %305 = vmatpush.msrb.mxu1 %v205_v34 }
  0x50   :  { %286 = vmatpush.msrb.mxu0 %v171_v37  ;;  %306 = vmatpush.msrb.mxu1 %v203_v38 }
  0x52   :  { %287 = vmatpush.msrb.mxu0 %v169_v41  ;;  %307 = vmatpush.msrb.mxu1 %v201_v42 }
  0xb0   :  { %v133_v12 = vpop.f32.mrf.mxu0  ;;  %v153_v13 = vpop.f32.mrf.mxu1 }
  0xb1   :  { %v134_v14 = vadd.f32 %v133_v12, %v112_v10  ;;  %v154_v15 = vadd.f32 %v153_v13, %v113_v11 }
  0xb3   :  { %v157_v16 = vsel %vm156_vm0, %v134_v14, -inf  ;;  %v158_v17 = vsel %vm156_vm0, %v154_v15, -inf }
  0xb4   :  { %v159_v18 = vmax.f32 %v157_v16, %v158_v17 }
  0xb6   :  { %160 = vmax.xlane.f32.xlu0 %v159_v18 }
 0x129   :  { %v161_v43 = vpop.xlane.xlu0 %160 }
 0x12a   :  { %v162_v44 = vsub.f32 %v134_v14, %v161_v43  ;;  %v163_v45 = vsub.f32 %v154_v15, %v161_v43 }
 0x12c   :  { %v164_v46 = vmul.f32 1.442695, %v162_v44  ;;  %v166_v47 = vmul.f32 1.442695, %v163_v45 }
 0x12e   :  { %376 = vpow2.f32 %v164_v46 }
 0x12f   :  { %378 = vpow2.f32 %v166_v47 }
 0x134   :  { %v377_v48 = vpop.eup %376 }
 0x135   :  { %v379_v49 = vpop.eup %378  ;;  %248 = vmatmul.f32.vlgmr.msra.gmra.mxu2 %v377_v48  ;;  %288 = vmatmul.f32.vlgmr.msrb.gmra.mxu0 %v377_v48 }
 0x136   :  { %268 = vmatmul.f32.vlgmr.msra.gmra.mxu3 %v379_v49  ;;  %308 = vmatmul.f32.vlgmr.msrb.gmra.mxu1 %v379_v49 }
 0x1b2   :  { %v289_v50 = vpop.f32.mrf.mxu0 }
 0x1b3   :  { %v309_v51 = vpop.f32.mrf.mxu1 }
 0x1b4   :  { %v310_v52 = vadd.f32 %v309_v51, %v289_v50 }
 0x1b6   :  { %v313_v53 = vmax.f32 %v310_v52, 1e-30 }
 0x1b8   :  { %380 = vrcp.f32 %v313_v53  ;;  %v249_v54 = vpop.f32.mrf.mxu2  ;;  %v339_v61 = vand.u32 2147483648, %v313_v53  ;;  %v337_v63 = vand.u32 2147483647, %v313_v53  ;;  %vm333_vm2 = vweird.f32 %v313_v53 }
 0x1b9   :  { %v269_v55 = vpop.f32.mrf.mxu3 }
 0x1ba   :  { %v270_v56 = vadd.f32 %v269_v55, %v249_v54  ;;  %v340_v3 = vor.u32 1.1754944e-38, %v339_v61  ;;  %vm338_vm4 = vcmp.eq.f32.partialorder %v337_v63, 8.507059e+37 }
 0x1bc   :  { %v312_v57 = vmax.f32 %v270_v56, 1e-30 }
 0x1be   :  { %v381_v58 = vpop.eup %380  ;;  %382 = vrcp.f32 %v312_v57  ;;  %v325_v6 = vand.u32 2147483648, %v312_v57  ;;  %v323_v9 = vand.u32 2147483647, %v312_v57  ;;  %vm319_vm6 = vweird.f32 %v312_v57 }
 0x1bf   :  { %v329_v59 = vmul.f32 %v381_v58, %v313_v53  ;;  %vm334_vm1 = vweird.f32 %v381_v58 }
 0x1c0   :  { %vm335_vm3 = vmor %vm333_vm2, %vm334_vm1  ;;  %v326_v12 = vor.u32 1.1754944e-38, %v325_v6  ;;  %vm324_vm8 = vcmp.eq.f32.partialorder %v323_v9, 8.507059e+37 }
 0x1c1   :  { %v330_v60 = vsub.f32 1.0, %v329_v59 }
 0x1c3   :  { %v331_v62 = vmul.f32 %v381_v58, %v330_v60 }
 0x1c4   :  { %v383_v0 = vpop.eup %382 }
 0x1c5   :  { %v315_v1 = vmul.f32 %v383_v0, %v312_v57  ;;  %v332_v2 = vadd.f32 %v381_v58, %v331_v62  ;;  %vm320_vm5 = vweird.f32 %v383_v0 }
 0x1c6   :  { %vm321_vm7 = vmor %vm319_vm6, %vm320_vm5 }
 0x1c7   :  { %v316_v4 = vsub.f32 1.0, %v315_v1  ;;  %v336_v5 = vsel %vm335_vm3, %v381_v58, %v332_v2 }
 0x1c8   :  { %v341_v7 = vsel %vm338_vm4, %v340_v3, %v336_v5 }
 0x1c9   :  { %v317_v8 = vmul.f32 %v383_v0, %v316_v4  ;;  %v343_v11 = vmul.f32 %v379_v49, %v341_v7 }
 0x1cb   :  { %v318_v10 = vadd.f32 %v383_v0, %v317_v8  ;;  %v346_v16 = vrot.slane %v343_v11, 6 }
 0x1cd   :  { %v322_v13 = vsel %vm321_vm7, %v383_v0, %v318_v10 }
 0x1ce   :  { %v327_v14 = vsel %vm324_vm8, %v326_v12, %v322_v13 }
 0x1cf   :  { %v342_v15 = vmul.f32 %v377_v48, %v327_v14 }
 0x1d1   :  { %v347_v17 = vsel %vm156_vm0, %v342_v15, %v346_v16 }
 0x1d2   :  { %349 = vst [vmem:[#allocation10] sm:$0xf] %v347_v17 }
 0x1d3   :  { %360 = dma.vmem_to_hbm [thread:$0]  %s356_s3, 64, %s358_s11, [#allocation4]  }
 0x1d4   :  { %510 = dma.done.wait [#allocation4], 64  }
 0x1d5   :  { %511 = vsyncadd [#allocation4], 4294967232 }
 0x1d6   :  { %365 = vsyncpa [#allocation3], 1 }
 0x1d7   :  { %366 = vsyncpa [#allocation6], 1 }
 0x1d8   :  { %367 = vsyncpa [#allocation9], 1 }
 0x1d9   :  { %368 = vsyncpa [#allocation4], 1 }

</bundles_post_ra>
